<compile_context>
chip_gen: v5e
topology: v5e:2x2
jax: 0.10.0
libtpu: 0.0.40
codegen_flags: <defaults>
</compile_context>

<pallas_src>
import functools

import jax
import jax.numpy as jnp
from jax.experimental import pallas as pl
from jax.experimental.pallas import tpu as pltpu

_LANE = 128
_SUBLANE = 8
_TILE_B_MAX = 2048        # fatter tiles amortize the ~0.35 us/step pipeline overhead
_MIN_SPLIT_BATCH = 256    # force >=2 grid steps above this so v7x uses both TCs
_VMEM_LIMIT_BYTES = 32 * 1024 * 1024


def _round_up(n, m):
    return ((n + m - 1) // m) * m


def _cdiv(a, b):
    return -(-a // b)


def _detect_bf16_epilogue():
    """bf16 VPU/EUP exist on v6e and later; keep the epilogue in f32 elsewhere."""
    try:
        kind = jax.devices()[0].device_kind.lower()
    except Exception:  # pragma: no cover - no devices at import time
        return False
    return any(tok in kind for tok in ("v6", "v7", "tpu7"))


_BF16_EPILOGUE = _detect_bf16_epilogue()


def _elu_to_bf16(z_f32):
    """nn.ELU(alpha=1.0) on the f32 pre-activation, returning bf16 for the next matmul.

    min() keeps the untaken exp branch from overflowing. On v6e/v7x the whole
    epilogue runs in bf16 (double packed VPU/EUP rate); on v5e it stays f32.
    """
    x = z_f32.astype(jnp.bfloat16) if _BF16_EPILOGUE else z_f32
    y = jnp.where(x > 0, x, jnp.exp(jnp.minimum(x, 0)) - 1)
    return y.astype(jnp.bfloat16)


def _mlp_tail(h_bf16, layers):
    """Apply (Linear+ELU)* Linear over `layers` = ((w_ref, b_ref), ...).

    bf16 matmuls with f32 MXU accumulation; bias-add in f32; ELU after every
    layer except the last. Returns the final f32 pre-activation.
    """
    n = len(layers)
    z = None
    for idx, (w, b) in enumerate(layers):
        z = jnp.dot(h_bf16, w[...], preferred_element_type=jnp.float32) + b[...]
        if idx < n - 1:
            h_bf16 = _elu_to_bf16(z)
    return z


# ----------------------------- kernels --------------------------------------


def _mlp4_kernel(x_ref, w0, b0, w1, b1, w2, b2, w3, b3, out_ref):
    h = x_ref[...].astype(jnp.bfloat16)
    out_ref[...] = _mlp_tail(h, ((w0, b0), (w1, b1), (w2, b2), (w3, b3)))


def _fused_kernel(xa_ref, xc_ref,
                  aw0, ab0, aw1, ab1, aw2, ab2, aw3, ab3,
                  cw0, cb0, cw1, cb1, cw2, cb2, cw3, cb3,
                  out_ref):
    # Last-layer weights are zero-padded into disjoint lane ranges (actor at
    # [0, num_actions), critic at lane num_actions), so the sum packs both
    # results into one lane-dense 128-wide output.
    za = _mlp_tail(xa_ref[...].astype(jnp.bfloat16),
                   ((aw0, ab0), (aw1, ab1), (aw2, ab2), (aw3, ab3)))
    zc = _mlp_tail(xc_ref[...].astype(jnp.bfloat16),
                   ((cw0, cb0), (cw1, cb1), (cw2, cb2), (cw3, cb3)))
    out_ref[...] = za + zc


def _fused_shared_kernel(x_ref, w0s, b0s,
                         aw1, ab1, aw2, ab2, aw3, ab3,
                         cw1, cb1, cw2, cb2, cw3, cb3,
                         out_ref):
    # Shared observations: layer 0 of actor and critic fused into one matmul
    # against the [K, 2*H] concatenated weight, then split on a 128-lane boundary.
    h0 = jnp.dot(x_ref[...].astype(jnp.bfloat16), w0s[...],
                 preferred_element_type=jnp.float32) + b0s[...]
    h0 = _elu_to_bf16(h0)
    ha_width = aw1.shape[0]
    ha = h0[:, :ha_width]
    hc = h0[:, ha_width:]
    za = _mlp_tail(ha, ((aw1, ab1), (aw2, ab2), (aw3, ab3)))
    zc = _mlp_tail(hc, ((cw1, cb1), (cw2, cb2), (cw3, cb3)))
    out_ref[...] = za + zc


# --------------------------- host-side helpers -------------------------------


def _batch_tiling(batch):
    """Balanced batch tiles; >=2 grid steps for large batches (v7x megacore)."""
    steps = _cdiv(batch, _TILE_B_MAX)
    if steps == 1 and batch >= _MIN_SPLIT_BATCH:
        steps = 2
    tile_b = _round_up(_cdiv(batch, steps), _SUBLANE)
    b_pad = _round_up(batch, tile_b)
    return tile_b, b_pad


def _compiler_params():
    return pltpu.CompilerParams(
        dimension_semantics=("parallel",),
        vmem_limit_bytes=_VMEM_LIMIT_BYTES,
    )


def _const_spec(shape):
    """Weights/biases: full-extent block, constant index_map (VMEM-resident)."""
    return pl.BlockSpec(shape, lambda i: (0, 0))


def _pad_rows(x, b_pad):
    batch = x.shape[0]
    if b_pad != batch:
        x = jnp.pad(x, ((0, b_pad - batch), (0, 0)))
    return x


def _prep_mlp(params, out_pad, col_off):
    """params = [(w [in,out] f32, b [out] f32), ...] -> flat bf16/f32 tuple.

    Hidden layers keep their true shapes (cast to bf16, bias -> [1,out] f32).
    The final layer is zero-padded to `out_pad` lanes with its real columns
    placed at [col_off, col_off+out_d); padded lanes stay exactly zero so they
    never leak into the sliced output.
    """
    flat = []
    n = len(params)
    for idx, (w, b) in enumerate(params):
        if idx == n - 1:
            in_d, out_d = w.shape
            assert col_off + out_d <= out_pad
            wp = jnp.zeros((in_d, out_pad), jnp.float32).at[:, col_off:col_off + out_d].set(w)
            bp = jnp.zeros((1, out_pad), jnp.float32).at[:, col_off:col_off + out_d].set(b)
            flat += [wp.astype(jnp.bfloat16), bp]
        else:
            flat += [w.astype(jnp.bfloat16), b.reshape(1, -1).astype(jnp.float32)]
    return tuple(flat)


# ------------------------------ jitted wrappers ------------------------------


@functools.partial(jax.jit, static_argnames=("out_dim", "col_off"))
def _mlp4_forward(x, flat, out_dim, col_off):
    """Single 4-layer MLP forward. Returns [B, out_dim] f32."""
    batch, in_dim = x.shape
    out_pad = flat[-2].shape[1]
    tile_b, b_pad = _batch_tiling(batch)
    x = _pad_rows(x, b_pad)
    w_specs = [_const_spec(a.shape) for a in flat]
    out = pl.pallas_call(
        _mlp4_kernel,
        out_shape=jax.ShapeDtypeStruct((b_pad, out_pad), jnp.float32),
        grid=(b_pad // tile_b,),
        in_specs=[pl.BlockSpec((tile_b, in_dim), lambda i: (i, 0))] + w_specs,
        out_specs=pl.BlockSpec((tile_b, out_pad), lambda i: (i, 0)),
        compiler_params=_compiler_params(),
    )(x, *flat)
    return out[:batch, col_off:col_off + out_dim]


@functools.partial(jax.jit, static_argnames=("act_dim",))
def _fused_forward(actor_obs, critic_obs, actor_flat, critic_flat, act_dim):
    """Fused actor+critic forward (distinct observations), single pallas_call."""
    batch, a_in = actor_obs.shape
    c_in = critic_obs.shape[1]
    out_pad = actor_flat[-2].shape[1]
    tile_b, b_pad = _batch_tiling(batch)
    actor_obs = _pad_rows(actor_obs, b_pad)
    critic_obs = _pad_rows(critic_obs, b_pad)
    flats = list(actor_flat) + list(critic_flat)
    w_specs = [_const_spec(a.shape) for a in flats]
    out = pl.pallas_call(
        _fused_kernel,
        out_shape=jax.ShapeDtypeStruct((b_pad, out_pad), jnp.float32),
        grid=(b_pad // tile_b,),
        in_specs=[pl.BlockSpec((tile_b, a_in), lambda i: (i, 0)),
                  pl.BlockSpec((tile_b, c_in), lambda i: (i, 0))] + w_specs,
        out_specs=pl.BlockSpec((tile_b, out_pad), lambda i: (i, 0)),
        compiler_params=_compiler_params(),
    )(actor_obs, critic_obs, *flats)
    return out[:batch, :act_dim], out[:batch, act_dim:act_dim + 1]


@functools.partial(jax.jit, static_argnames=("act_dim",))
def _fused_shared_forward(obs, shared_flat, act_dim):
    """Fused actor+critic forward when both networks see the same observations."""
    batch, in_dim = obs.shape
    out_pad = shared_flat[-2].shape[1]
    tile_b, b_pad = _batch_tiling(batch)
    obs = _pad_rows(obs, b_pad)
    w_specs = [_const_spec(a.shape) for a in shared_flat]
    out = pl.pallas_call(
        _fused_shared_kernel,
        out_shape=jax.ShapeDtypeStruct((b_pad, out_pad), jnp.float32),
        grid=(b_pad // tile_b,),
        in_specs=[pl.BlockSpec((tile_b, in_dim), lambda i: (i, 0))] + w_specs,
        out_specs=pl.BlockSpec((tile_b, out_pad), lambda i: (i, 0)),
        compiler_params=_compiler_params(),
    )(obs, *shared_flat)
    return out[:batch, :act_dim], out[:batch, act_dim:act_dim + 1]


# ------------------------------ module wrapper --------------------------------


def _init_linear(key, in_dim, out_dim):
    """Deterministic torch-Linear-style init; weight layout [in, out]."""
    kw, kb = jax.random.split(key)
    bound = 1.0 / jnp.sqrt(jnp.float32(in_dim))
    w = jax.random.uniform(kw, (in_dim, out_dim), jnp.float32, -bound, bound)
    b = jax.random.uniform(kb, (out_dim,), jnp.float32, -bound, bound)
    return w, b


class ActorCriticPallas:
    """JAX/Pallas equivalent of the PyTorch ActorCritic module's forward math."""

    is_recurrent = False

    def __init__(self, num_actor_obs, num_critic_obs, num_actions,
                 actor_hidden_dims=(256, 256, 256),
                 critic_hidden_dims=(256, 256, 256),
                 init_noise_std=1.0, seed=0):
        key = jax.random.PRNGKey(seed)
        keys = jax.random.split(key, 16)

        dims_a = [num_actor_obs] + list(actor_hidden_dims) + [num_actions]
        self.actor_params = [_init_linear(keys[i], dims_a[i], dims_a[i + 1])
                             for i in range(len(dims_a) - 1)]
        dims_c = [num_critic_obs] + list(critic_hidden_dims) + [1]
        self.critic_params = [_init_linear(keys[8 + i], dims_c[i], dims_c[i + 1])
                              for i in range(len(dims_c) - 1)]

        self.num_actions = num_actions
        # Packed output layout: actor mean in lanes [0, num_actions), critic value
        # in lane num_actions, all inside one 128-lane-aligned frame.
        out_pad = _round_up(num_actions + 1, _LANE)
        self._value_col = num_actions
        self._actor_flat = _prep_mlp(self.actor_params, out_pad, 0)
        self._critic_flat = _prep_mlp(self.critic_params, out_pad, num_actions)

        # Shared-observation fast path: fuse layer 0 of both nets into one matmul.
        self._shared_flat = None
        if num_actor_obs == num_critic_obs:
            aw0, ab0 = self.actor_params[0]
            cw0, cb0 = self.critic_params[0]
            w0s = jnp.concatenate([aw0, cw0], axis=1).astype(jnp.bfloat16)
            b0s = jnp.concatenate([ab0, cb0]).reshape(1, -1).astype(jnp.float32)
            self._shared_flat = (w0s, b0s) + self._actor_flat[2:] + self._critic_flat[2:]

        # Learnable per-action std (init_noise_std * ones).
        self.std = init_noise_std * jnp.ones((num_actions,), jnp.float32)

    # --- torch-module-equivalent forward methods ---

    def act_inference(self, observations):
        return _mlp4_forward(observations, self._actor_flat, self.num_actions, 0)

    def evaluate(self, critic_observations):
        return _mlp4_forward(critic_observations, self._critic_flat, 1, self._value_col)

    def update_distribution(self, observations):
        mean = self.act_inference(observations)
        # Same expression as torch (`mean * 0.0 + self.std`) so NaN/Inf propagate.
        std = mean * 0.0 + self.std
        return mean, std

    def act_and_evaluate(self, actor_obs, critic_obs):
        """Fused single-pallas_call rollout path returning (mean, std, value)."""
        if self._shared_flat is not None and actor_obs is critic_obs:
            mean, value = _fused_shared_forward(actor_obs, self._shared_flat,
                                                self.num_actions)
        else:
            mean, value = _fused_forward(actor_obs, critic_obs, self._actor_flat,
                                         self._critic_flat, self.num_actions)
        std = mean * 0.0 + self.std
        return mean, std, value


# ------------------------------ reference & test ------------------------------


def _mlp_reference(x, params):
    """Pure-JAX reference using the same bf16-matmul / f32-accumulate / ELU math."""
    h = x.astype(jnp.bfloat16)
    n = len(params)
    z = None
    for i, (w, b) in enumerate(params):
        z = jnp.dot(h, w.astype(jnp.bfloat16),
                    preferred_element_type=jnp.float32) + b[None, :]
        if i < n - 1:
            h = _elu_to_bf16(z)
    return z


if __name__ == "__main__":
    num_actor_obs = 48
    num_critic_obs = 48
    num_actions = 12

    model = ActorCriticPallas(num_actor_obs, num_critic_obs, num_actions)
    key = jax.random.PRNGKey(0)

    # Small batch (toy) and a batch that exercises row padding + a 2-step grid.
    for batch in (4, 300):
        k_a, k_c = jax.random.split(jax.random.fold_in(key, batch))
        actor_obs = jax.random.normal(k_a, (batch, num_actor_obs), jnp.float32)
        critic_obs = jax.random.normal(k_c, (batch, num_critic_obs), jnp.float32)

        mean, std = model.update_distribution(actor_obs)
        value = model.evaluate(critic_obs)
        mean_f, std_f, value_f = model.act_and_evaluate(actor_obs, critic_obs)
        mean_s, std_s, value_s = model.act_and_evaluate(actor_obs, actor_obs)
        jax.block_until_ready((mean, std, value, mean_f, std_f, value_f,
                               mean_s, std_s, value_s))

        mean_ref = _mlp_reference(actor_obs, model.actor_params)
        value_ref = _mlp_reference(critic_obs, model.critic_params)
        value_ref_s = _mlp_reference(actor_obs, model.critic_params)

        assert mean.shape == (batch, num_actions)
        assert std.shape == (batch, num_actions)
        assert value.shape == (batch, 1)
        assert mean_f.shape == (batch, num_actions) and value_f.shape == (batch, 1)
        assert jnp.allclose(mean, mean_ref, atol=1e-2, rtol=1e-2)
        assert jnp.allclose(value, value_ref, atol=1e-2, rtol=1e-2)
        assert jnp.allclose(mean_f, mean_ref, atol=1e-2, rtol=1e-2)
        assert jnp.allclose(value_f, value_ref, atol=1e-2, rtol=1e-2)
        assert jnp.allclose(mean_s, mean_ref, atol=1e-2, rtol=1e-2)
        assert jnp.allclose(value_s, value_ref_s, atol=1e-2, rtol=1e-2)
        assert jnp.allclose(std, jnp.broadcast_to(model.std, mean.shape))
        assert jnp.allclose(std_f, jnp.broadcast_to(model.std, mean.shape))

    # TODO(synk): distribution.sample()/log_prob()/entropy() are host-side Normal
    # math on the kernel outputs (mean, std); not part of the Pallas hot path.
    print("KERNEL_OK")
</pallas_src>

<mosaic_0001>
module attributes {stable_mosaic.version = 11 : i64} {
  func.func @_mlp4_kernel(%arg0: i32, %arg1: memref<8x48xf32, #tpu.memory_space<vmem>>, %arg2: memref<48x256xbf16, #tpu.memory_space<vmem>>, %arg3: memref<1x256xf32, #tpu.memory_space<vmem>>, %arg4: memref<256x256xbf16, #tpu.memory_space<vmem>>, %arg5: memref<1x256xf32, #tpu.memory_space<vmem>>, %arg6: memref<256x256xbf16, #tpu.memory_space<vmem>>, %arg7: memref<1x256xf32, #tpu.memory_space<vmem>>, %arg8: memref<256x128xbf16, #tpu.memory_space<vmem>>, %arg9: memref<1x128xf32, #tpu.memory_space<vmem>>, %arg10: memref<8x128xf32, #tpu.memory_space<vmem>>) attributes {dimension_semantics = [#tpu.dimension_semantics<parallel>], iteration_bounds = array<i64: 1>, scalar_prefetch = 0 : i64, scratch_operands = 0 : i64, tpu.core_type = #tpu.core_type<tc>, window_params = [{transform_indices = @transform_0, window_bounds = array<i64: 8, 48>}, {pipeline_mode = #tpu.pipeline_mode<synchronous>, transform_indices = @transform_1, window_bounds = array<i64: 48, 256>}, {pipeline_mode = #tpu.pipeline_mode<synchronous>, transform_indices = @transform_2, window_bounds = array<i64: 1, 256>}, {pipeline_mode = #tpu.pipeline_mode<synchronous>, transform_indices = @transform_3, window_bounds = array<i64: 256, 256>}, {pipeline_mode = #tpu.pipeline_mode<synchronous>, transform_indices = @transform_4, window_bounds = array<i64: 1, 256>}, {pipeline_mode = #tpu.pipeline_mode<synchronous>, transform_indices = @transform_5, window_bounds = array<i64: 256, 256>}, {pipeline_mode = #tpu.pipeline_mode<synchronous>, transform_indices = @transform_6, window_bounds = array<i64: 1, 256>}, {pipeline_mode = #tpu.pipeline_mode<synchronous>, transform_indices = @transform_7, window_bounds = array<i64: 256, 128>}, {pipeline_mode = #tpu.pipeline_mode<synchronous>, transform_indices = @transform_8, window_bounds = array<i64: 1, 128>}, {transform_indices = @transform_9, window_bounds = array<i64: 8, 128>}]} {
    %c0 = arith.constant 0 : index
    %c0_0 = arith.constant 0 : index
    %0 = vector.load %arg1[%c0, %c0_0] : memref<8x48xf32, #tpu.memory_space<vmem>>, vector<8x48xf32>
    %1 = arith.truncf %0 : vector<8x48xf32> to vector<8x48xbf16>
    %c0_1 = arith.constant 0 : index
    %c0_2 = arith.constant 0 : index
    %2 = vector.load %arg2[%c0_1, %c0_2] : memref<48x256xbf16, #tpu.memory_space<vmem>>, vector<48x256xbf16>
    %cst = arith.constant dense<0.000000e+00> : vector<8x256xf32>
    %3 = tpu.matmul %1, %2, %cst {dimension_numbers = #tpu.dot_dimension_numbers<[1], [0], [0], [1], [0, 0, 1, 1], [], []>} : vector<8x48xbf16>, vector<48x256xbf16>, vector<8x256xf32> -> vector<8x256xf32>
    %c0_3 = arith.constant 0 : index
    %c0_4 = arith.constant 0 : index
    %4 = vector.load %arg3[%c0_3, %c0_4] : memref<1x256xf32, #tpu.memory_space<vmem>>, vector<1x256xf32>
    %5 = vector.broadcast %4 : vector<1x256xf32> to vector<8x256xf32>
    %6 = arith.addf %3, %5 : vector<8x256xf32>
    %cst_5 = arith.constant 0.000000e+00 : f32
    %7 = vector.broadcast %cst_5 : f32 to vector<8x256xf32>
    %8 = arith.cmpf ogt, %6, %7 : vector<8x256xf32>
    %cst_6 = arith.constant 0.000000e+00 : f32
    %9 = vector.broadcast %cst_6 : f32 to vector<8x256xf32>
    %10 = arith.minimumf %6, %9 : vector<8x256xf32>
    %11 = math.exp %10 : vector<8x256xf32>
    %cst_7 = arith.constant 1.000000e+00 : f32
    %12 = vector.broadcast %cst_7 : f32 to vector<8x256xf32>
    %13 = arith.subf %11, %12 : vector<8x256xf32>
    %14 = arith.select %8, %6, %13 : vector<8x256xi1>, vector<8x256xf32>
    %15 = arith.truncf %14 : vector<8x256xf32> to vector<8x256xbf16>
    %c0_8 = arith.constant 0 : index
    %c0_9 = arith.constant 0 : index
    %16 = vector.load %arg4[%c0_8, %c0_9] : memref<256x256xbf16, #tpu.memory_space<vmem>>, vector<256x256xbf16>
    %cst_10 = arith.constant dense<0.000000e+00> : vector<8x256xf32>
    %17 = tpu.matmul %15, %16, %cst_10 {dimension_numbers = #tpu.dot_dimension_numbers<[1], [0], [0], [1], [0, 0, 1, 1], [], []>} : vector<8x256xbf16>, vector<256x256xbf16>, vector<8x256xf32> -> vector<8x256xf32>
    %c0_11 = arith.constant 0 : index
    %c0_12 = arith.constant 0 : index
    %18 = vector.load %arg5[%c0_11, %c0_12] : memref<1x256xf32, #tpu.memory_space<vmem>>, vector<1x256xf32>
    %19 = vector.broadcast %18 : vector<1x256xf32> to vector<8x256xf32>
    %20 = arith.addf %17, %19 : vector<8x256xf32>
    %cst_13 = arith.constant 0.000000e+00 : f32
    %21 = vector.broadcast %cst_13 : f32 to vector<8x256xf32>
    %22 = arith.cmpf ogt, %20, %21 : vector<8x256xf32>
    %cst_14 = arith.constant 0.000000e+00 : f32
    %23 = vector.broadcast %cst_14 : f32 to vector<8x256xf32>
    %24 = arith.minimumf %20, %23 : vector<8x256xf32>
    %25 = math.exp %24 : vector<8x256xf32>
    %cst_15 = arith.constant 1.000000e+00 : f32
    %26 = vector.broadcast %cst_15 : f32 to vector<8x256xf32>
    %27 = arith.subf %25, %26 : vector<8x256xf32>
    %28 = arith.select %22, %20, %27 : vector<8x256xi1>, vector<8x256xf32>
    %29 = arith.truncf %28 : vector<8x256xf32> to vector<8x256xbf16>
    %c0_16 = arith.constant 0 : index
    %c0_17 = arith.constant 0 : index
    %30 = vector.load %arg6[%c0_16, %c0_17] : memref<256x256xbf16, #tpu.memory_space<vmem>>, vector<256x256xbf16>
    %cst_18 = arith.constant dense<0.000000e+00> : vector<8x256xf32>
    %31 = tpu.matmul %29, %30, %cst_18 {dimension_numbers = #tpu.dot_dimension_numbers<[1], [0], [0], [1], [0, 0, 1, 1], [], []>} : vector<8x256xbf16>, vector<256x256xbf16>, vector<8x256xf32> -> vector<8x256xf32>
    %c0_19 = arith.constant 0 : index
    %c0_20 = arith.constant 0 : index
    %32 = vector.load %arg7[%c0_19, %c0_20] : memref<1x256xf32, #tpu.memory_space<vmem>>, vector<1x256xf32>
    %33 = vector.broadcast %32 : vector<1x256xf32> to vector<8x256xf32>
    %34 = arith.addf %31, %33 : vector<8x256xf32>
    %cst_21 = arith.constant 0.000000e+00 : f32
    %35 = vector.broadcast %cst_21 : f32 to vector<8x256xf32>
    %36 = arith.cmpf ogt, %34, %35 : vector<8x256xf32>
    %cst_22 = arith.constant 0.000000e+00 : f32
    %37 = vector.broadcast %cst_22 : f32 to vector<8x256xf32>
    %38 = arith.minimumf %34, %37 : vector<8x256xf32>
    %39 = math.exp %38 : vector<8x256xf32>
    %cst_23 = arith.constant 1.000000e+00 : f32
    %40 = vector.broadcast %cst_23 : f32 to vector<8x256xf32>
    %41 = arith.subf %39, %40 : vector<8x256xf32>
    %42 = arith.select %36, %34, %41 : vector<8x256xi1>, vector<8x256xf32>
    %43 = arith.truncf %42 : vector<8x256xf32> to vector<8x256xbf16>
    %c0_24 = arith.constant 0 : index
    %c0_25 = arith.constant 0 : index
    %44 = vector.load %arg8[%c0_24, %c0_25] : memref<256x128xbf16, #tpu.memory_space<vmem>>, vector<256x128xbf16>
    %cst_26 = arith.constant dense<0.000000e+00> : vector<8x128xf32>
    %45 = tpu.matmul %43, %44, %cst_26 {dimension_numbers = #tpu.dot_dimension_numbers<[1], [0], [0], [1], [0, 0, 1, 1], [], []>} : vector<8x256xbf16>, vector<256x128xbf16>, vector<8x128xf32> -> vector<8x128xf32>
    %c0_27 = arith.constant 0 : index
    %c0_28 = arith.constant 0 : index
    %46 = vector.load %arg9[%c0_27, %c0_28] : memref<1x128xf32, #tpu.memory_space<vmem>>, vector<1x128xf32>
    %47 = vector.broadcast %46 : vector<1x128xf32> to vector<8x128xf32>
    %48 = arith.addf %45, %47 : vector<8x128xf32>
    %c0_29 = arith.constant 0 : index
    %c0_30 = arith.constant 0 : index
    %49 = vector.load %arg10[%c0_29, %c0_30] : memref<8x128xf32, #tpu.memory_space<vmem>>, vector<8x128xf32>
    tpu.vector_store %arg10[%c0_29, %c0_30], %48 {strides = array<i32>} : memref<8x128xf32, #tpu.memory_space<vmem>>, vector<8x128xf32>,
    return
  }
  func.func @transform_0(%arg0: i32) -> (i32, i32) {
    %c0_i32 = arith.constant 0 : i32
    %c0_i32_0 = arith.constant 0 : i32
    return %arg0, %c0_i32 : i32, i32
  }
  func.func @transform_1(%arg0: i32) -> (i32, i32) {
    %c0_i32 = arith.constant 0 : i32
    %c0_i32_0 = arith.constant 0 : i32
    %c0_i32_1 = arith.constant 0 : i32
    return %c0_i32, %c0_i32_0 : i32, i32
  }
  func.func @transform_2(%arg0: i32) -> (i32, i32) {
    %c0_i32 = arith.constant 0 : i32
    %c0_i32_0 = arith.constant 0 : i32
    %c0_i32_1 = arith.constant 0 : i32
    return %c0_i32, %c0_i32_0 : i32, i32
  }
  func.func @transform_3(%arg0: i32) -> (i32, i32) {
    %c0_i32 = arith.constant 0 : i32
    %c0_i32_0 = arith.constant 0 : i32
    %c0_i32_1 = arith.constant 0 : i32
    return %c0_i32, %c0_i32_0 : i32, i32
  }
  func.func @transform_4(%arg0: i32) -> (i32, i32) {
    %c0_i32 = arith.constant 0 : i32
    %c0_i32_0 = arith.constant 0 : i32
    %c0_i32_1 = arith.constant 0 : i32
    return %c0_i32, %c0_i32_0 : i32, i32
  }
  func.func @transform_5(%arg0: i32) -> (i32, i32) {
    %c0_i32 = arith.constant 0 : i32
    %c0_i32_0 = arith.constant 0 : i32
    %c0_i32_1 = arith.constant 0 : i32
    return %c0_i32, %c0_i32_0 : i32, i32
  }
  func.func @transform_6(%arg0: i32) -> (i32, i32) {
    %c0_i32 = arith.constant 0 : i32
    %c0_i32_0 = arith.constant 0 : i32
    %c0_i32_1 = arith.constant 0 : i32
    return %c0_i32, %c0_i32_0 : i32, i32
  }
  func.func @transform_7(%arg0: i32) -> (i32, i32) {
    %c0_i32 = arith.constant 0 : i32
    %c0_i32_0 = arith.constant 0 : i32
    %c0_i32_1 = arith.constant 0 : i32
    return %c0_i32, %c0_i32_0 : i32, i32
  }
  func.func @transform_8(%arg0: i32) -> (i32, i32) {
    %c0_i32 = arith.constant 0 : i32
    %c0_i32_0 = arith.constant 0 : i32
    %c0_i32_1 = arith.constant 0 : i32
    return %c0_i32, %c0_i32_0 : i32, i32
  }
  func.func @transform_9(%arg0: i32) -> (i32, i32) {
    %c0_i32 = arith.constant 0 : i32
    %c0_i32_0 = arith.constant 0 : i32
    return %arg0, %c0_i32 : i32, i32
  }
}

</mosaic_0001>

<bundles_post_ra>
// kernel: _mlp4_forward.1
= control target key start
LH: loop header
LB: loop body
LE: loop exit
PB: predicated region body
PF: predicated region fallthrough
CT: control target
= control target key end

     0   :  { %14 = vsyncpa [#allocation3], 0  ;;  %s1527_s0 = inlined_call_operand.vmem [shape: f32[8,48], index: 0, kind: input, shape index: {}]   ;;  %s1528_s1 = inlined_call_operand.hbm [shape: bf16[48,256], index: 1, kind: input, shape index: {}]   ;;  %s1529_s2 = inlined_call_operand.vmem [shape: f32[1,256], index: 2, kind: input, shape index: {}]   ;;  %s1530_s3 = inlined_call_operand.hbm [shape: bf16[256,256], index: 3, kind: input, shape index: {}]   ;;  %s1531_s4 = inlined_call_operand.vmem [shape: f32[1,256], index: 4, kind: input, shape index: {}]   ;;  %s1532_s5 = inlined_call_operand.hbm [shape: bf16[256,256], index: 5, kind: input, shape index: {}]   ;;  %s1533_s6 = inlined_call_operand.vmem [shape: f32[1,256], index: 6, kind: input, shape index: {}]   ;;  %s1534_s7 = inlined_call_operand.hbm [shape: bf16[256,128], index: 7, kind: input, shape index: {}]   ;;  %s1535_s8 = inlined_call_operand.vmem [shape: f32[1,128], index: 8, kind: input, shape index: {}]   ;;  %s1536_s9 = inlined_call_operand.vmem [shape: f32[8,128], index: 9, kind: output, shape index: {}]  }
   0x1   :  { %15 = vsyncpa [#allocation5], 0 }
   0x2   :  { %16 = vsyncpa [#allocation8], 0  ;;  %s38_s11 = sshll.u32 %s1530_s3, 4  ;;  %s1439_s12 = smov [#allocation4]   ;;  %s39_s11 = int_to_ptr.hbm [resolvable:$true] %s38_s11 }
   0x3   :  { %s40_s13 = sshll.u32 %s1439_s12, 4  ;;  %s23_s16 = sshll.u32 %s1528_s1, 4  ;;  %s41_s13 = int_to_ptr.vmem [resolvable:$true] %s40_s13  ;;  %s24_s16 = int_to_ptr.hbm [resolvable:$true] %s23_s16 }
   0x4   :  { %s1440_s17 = smov 128   ;;  %s1441_s18 = smov 8  }
   0x5   :  { %46 = dma.hbm_to_vmem [thread:$0]  %s39_s11, 4096, %s41_s13, [#allocation5], %s1440_s17, %s1440_s17, %s1441_s18  }
   0x6   :  { %s1442_s19 = smov [#allocation2]   ;;  %s53_s23 = sshll.u32 %s1532_s5, 4  ;;  %s54_s23 = int_to_ptr.hbm [resolvable:$true] %s53_s23 }
   0x7   :  { %s25_s20 = sshll.u32 %s1442_s19, 4  ;;  %s68_s25 = sshll.u32 %s1534_s7, 4  ;;  %s26_s20 = int_to_ptr.vmem [resolvable:$true] %s25_s20  ;;  %s69_s25 = int_to_ptr.hbm [resolvable:$true] %s68_s25 }
   0x8   :  { %31 = dma.hbm_to_vmem [thread:$0]  %s24_s16, 768, %s26_s20, [#allocation3], %s1440_s17, %s1440_s17, %s1441_s18  }
   0x9   :  { %s1443_s26 = smov [#allocation6]   ;;  %s1444_s1 = smov [#allocation7]  }
   0xa   :  { %s55_s27 = sshll.u32 %s1443_s26, 4  ;;  %s70_s28 = sshll.u32 %s1444_s1, 4  ;;  %s56_s27 = int_to_ptr.vmem [resolvable:$true] %s55_s27  ;;  %s71_s28 = int_to_ptr.vmem [resolvable:$true] %s70_s28 }
   0xb   :  { %61 = dma.hbm_to_vmem [thread:$0]  %s54_s23, 4096, %s56_s27, [#allocation5], %s1440_s17, %s1440_s17, %s1441_s18  }
   0xc   :  { %s1445_s29 = smov 64   ;;  %s1446_s30 = smov 4  }
   0xd   :  { %76 = dma.hbm_to_vmem [thread:$0]  %s69_s25, 2048, %s71_s28, [#allocation8], %s1445_s29, %s1445_s29, %s1446_s30  }
   0xe   :  { %1433 = dma.done.wait [#allocation3], 768  }
   0xf   :  { %1434 = vsyncadd [#allocation3], 4294966528 }
  0x10   :  { %1435 = dma.done.wait [#allocation5], 8192  }
  0x11   :  { %1436 = vsyncadd [#allocation5], 4294959104 }
  0x12   :  { %1437 = dma.done.wait [#allocation8], 2048  }
  0x13   :  { %1438 = vsyncadd [#allocation8], 4294965248  ;;  %v896_v0 = vld [vmem:[#allocation2 + $0x20] sm:$0xf]  ;;  %v1235_v1 = vld [vmem:[#allocation2 + $0x24] sm:$0xf0] }
  0x14   :  { %v1234_v2 = vld [vmem:[#allocation2 + $0x24] sm:$0xf]  ;;  %v897_v3 = vor.u32 %v1235_v1, %v896_v0  ;;  %v898_v4 = vld [vmem:[#allocation2 + $0x28] sm:$0xf0]  ;;  %v888_v5 = vld [vmem:[#allocation2 + $0x10] sm:$0xf] }
  0x15   :  { %v1233_v6 = vld [vmem:[#allocation2 + $0x14] sm:$0xf0]  ;;  %v901_v7 = vor.u32 %v1234_v2, %v898_v4  ;;  %v1232_v8 = vld [vmem:[#allocation2 + $0x14] sm:$0xf]  ;;  %v890_v9 = vld [vmem:[#allocation2 + $0x18] sm:$0xf0] }
  0x16   :  { %149 = vmatpush.bf16.msra.mxu0 %v897_v3  ;;  %v889_v10 = vor.u32 %v1233_v6, %v888_v5  ;;  %v880_v11 = vld [vmem:[#allocation2] sm:$0xf]  ;;  %v1231_v12 = vld [vmem:[#allocation2 + $0x4] sm:$0xf0]  ;;  %v1230_v13 = vld [vmem:[#allocation2 + $0x4] sm:$0xf]  ;;  %v893_v14 = vor.u32 %v1232_v8, %v890_v9 }
  0x17   :  { %162 = vmatpush.bf16.msra.mxu1 %v901_v7  ;;  %v882_v15 = vld [vmem:[#allocation2 + $0x8] sm:$0xf0]  ;;  %v964_v16 = vld [vmem:[#allocation4 + $0x70] sm:$0xf]  ;;  %v1251_v17 = vld [vmem:[#allocation4 + $0x74] sm:$0xf0]  ;;  %v881_v27 = vor.u32 %v1231_v12, %v880_v11 }
  0x18   :  { %v96_v18 = vld [vmem:[%s1527_s0] sm:$0xff]  ;;  %v965_v19 = vor.u32 %v1251_v17, %v964_v16  ;;  %v1267_v21 = vld [vmem:[#allocation4 + $0xf4] sm:$0xf0]  ;;  %v966_v24 = vld [vmem:[#allocation4 + $0x78] sm:$0xf0]  ;;  %v885_v31 = vor.u32 %v1230_v13, %v882_v15  ;;  %vm140_vm0 = vcmask 392192  }
  0x19   :  { %v1028_v20 = vld [vmem:[#allocation4 + $0xf0] sm:$0xf]  ;;  %v1250_v22 = vld [vmem:[#allocation4 + $0x74] sm:$0xf]  ;;  %v1030_v26 = vld [vmem:[#allocation4 + $0xf8] sm:$0xf0]  ;;  %v97_v42 = vpack.c.bf16 %v96_v18, %v96_v18 }
  0x1a   :  { %v1029_v23 = vor.u32 %v1267_v21, %v1028_v20  ;;  %v1266_v25 = vld [vmem:[#allocation4 + $0xf4] sm:$0xf]  ;;  %150 = vmatpush.bf16.msra.mxu0 %v889_v10  ;;  %382 = vmatpush.bf16.msra.mxu2 %v965_v19  ;;  %v956_v28 = vld [vmem:[#allocation4 + $0x60] sm:$0xf]  ;;  %v1249_v29 = vld [vmem:[#allocation4 + $0x64] sm:$0xf0]  ;;  %v969_v32 = vor.u32 %v1250_v22, %v966_v24 }
  0x1b   :  { %v1020_v30 = vld [vmem:[#allocation4 + $0xe0] sm:$0xf]  ;;  %163 = vmatpush.bf16.msra.mxu1 %v893_v14  ;;  %v957_v33 = vor.u32 %v1249_v29, %v956_v28  ;;  %v1265_v34 = vld [vmem:[#allocation4 + $0xe4] sm:$0xf0]  ;;  %v1248_v35 = vld [vmem:[#allocation4 + $0x64] sm:$0xf]  ;;  %v1033_v37 = vor.u32 %v1266_v25, %v1030_v26 }
  0x1c   :  { %395 = vmatpush.bf16.msra.mxu3 %v1029_v23  ;;  %v958_v36 = vld [vmem:[#allocation4 + $0x68] sm:$0xf0]  ;;  %v1021_v38 = vor.u32 %v1265_v34, %v1020_v30  ;;  %v1264_v39 = vld [vmem:[#allocation4 + $0xe4] sm:$0xf]  ;;  %v948_v41 = vld [vmem:[#allocation4 + $0x50] sm:$0xf] }
  0x1d   :  { %v1022_v40 = vld [vmem:[#allocation4 + $0xe8] sm:$0xf0]  ;;  %v1247_v43 = vld [vmem:[#allocation4 + $0x54] sm:$0xf0]  ;;  %v1012_v44 = vld [vmem:[#allocation4 + $0xd0] sm:$0xf]  ;;  %v961_v47 = vor.u32 %v1248_v35, %v958_v36 }
  0x1e   :  { %v1263_v45 = vld [vmem:[#allocation4 + $0xd4] sm:$0xf0]  ;;  %151 = vmatpush.bf16.msra.mxu0 %v881_v27  ;;  %383 = vmatpush.bf16.msra.mxu2 %v957_v33  ;;  %v949_v46 = vor.u32 %v1247_v43, %v948_v41  ;;  %v1025_v48 = vor.u32 %v1264_v39, %v1022_v40  ;;  %v1246_v50 = vld [vmem:[#allocation4 + $0x54] sm:$0xf]  ;;  %v950_v51 = vld [vmem:[#allocation4 + $0x58] sm:$0xf0] }
  0x1f   :  { %164 = vmatpush.bf16.msra.mxu1 %v885_v31  ;;  %v1013_v49 = vor.u32 %v1263_v45, %v1012_v44  ;;  %v1262_v52 = vld [vmem:[#allocation4 + $0xd4] sm:$0xf]  ;;  %v1014_v53 = vld [vmem:[#allocation4 + $0xd8] sm:$0xf0]  ;;  %v953_v54 = vor.u32 %v1246_v50, %v950_v51  ;;  %v940_v56 = vld [vmem:[#allocation4 + $0x40] sm:$0xf] }
  0x20   :  { %396 = vmatpush.bf16.msra.mxu3 %v1021_v38  ;;  %v1017_v55 = vor.u32 %v1262_v52, %v1014_v53  ;;  %v1245_v57 = vld [vmem:[#allocation4 + $0x44] sm:$0xf0]  ;;  %v1004_v58 = vld [vmem:[#allocation4 + $0xc0] sm:$0xf]  ;;  %v1244_v61 = vld [vmem:[#allocation4 + $0x44] sm:$0xf] }
  0x21   :  { %902 = vmatmul.msk.bf16.vlgmr.msra.gmra.mxu0 %vm140_vm0, %v97_v42  ;;  %v941_v59 = vor.u32 %v1245_v57, %v940_v56  ;;  %v1261_v60 = vld [vmem:[#allocation4 + $0xc4] sm:$0xf0]  ;;  %v942_v62 = vld [vmem:[#allocation4 + $0x48] sm:$0xf0]  ;;  %v1260_v1 = vld [vmem:[#allocation4 + $0xc4] sm:$0xf] }
  0x22   :  { %408 = vmatpush.bf16.msrb.mxu0 %v969_v32  ;;  %903 = vmatmul.msk.bf16.vlgmr.msra.gmra.mxu1 %vm140_vm0, %v97_v42  ;;  %v1005_v63 = vor.u32 %v1261_v60, %v1004_v58  ;;  %v945_v0 = vor.u32 %v1244_v61, %v942_v62  ;;  %v1006_v2 = vld [vmem:[#allocation4 + $0xc8] sm:$0xf0]  ;;  %v932_v4 = vld [vmem:[#allocation4 + $0x30] sm:$0xf]  ;;  %v1243_v5 = vld [vmem:[#allocation4 + $0x34] sm:$0xf0] }
  0x23   :  { %421 = vmatpush.bf16.msrb.mxu1 %v1033_v37  ;;  %384 = vmatpush.bf16.msra.mxu2 %v949_v46  ;;  %v1009_v3 = vor.u32 %v1260_v1, %v1006_v2  ;;  %v996_v6 = vld [vmem:[#allocation4 + $0xb0] sm:$0xf]  ;;  %v933_v7 = vor.u32 %v1243_v5, %v932_v4  ;;  %v1259_v8 = vld [vmem:[#allocation4 + $0xb4] sm:$0xf0]  ;;  %v1242_v9 = vld [vmem:[#allocation4 + $0x34] sm:$0xf] }
  0x24   :  { %397 = vmatpush.bf16.msra.mxu3 %v1013_v49  ;;  %v934_v10 = vld [vmem:[#allocation4 + $0x38] sm:$0xf0]  ;;  %v997_v11 = vor.u32 %v1259_v8, %v996_v6  ;;  %v1258_v13 = vld [vmem:[#allocation4 + $0xb4] sm:$0xf]  ;;  %v924_v16 = vld [vmem:[#allocation4 + $0x20] sm:$0xf] }
  0x25   :  { %v937_v12 = vor.u32 %v1242_v9, %v934_v10  ;;  %v998_v14 = vld [vmem:[#allocation4 + $0xb8] sm:$0xf0]  ;;  %v1241_v17 = vld [vmem:[#allocation4 + $0x24] sm:$0xf0]  ;;  %v988_v18 = vld [vmem:[#allocation4 + $0xa0] sm:$0xf] }
  0x26   :  { %409 = vmatpush.bf16.msrb.mxu0 %v961_v47  ;;  %v1001_v15 = vor.u32 %v1258_v13, %v998_v14  ;;  %v925_v19 = vor.u32 %v1241_v17, %v924_v16  ;;  %v1257_v20 = vld [vmem:[#allocation4 + $0xa4] sm:$0xf0]  ;;  %v1240_v21 = vld [vmem:[#allocation4 + $0x24] sm:$0xf]  ;;  %v926_v22 = vld [vmem:[#allocation4 + $0x28] sm:$0xf0] }
  0x27   :  { %422 = vmatpush.bf16.msrb.mxu1 %v1025_v48  ;;  %385 = vmatpush.bf16.msra.mxu2 %v941_v59  ;;  %v989_v23 = vor.u32 %v1257_v20, %v988_v18  ;;  %v929_v24 = vor.u32 %v1240_v21, %v926_v22  ;;  %v1256_v25 = vld [vmem:[#allocation4 + $0xa4] sm:$0xf]  ;;  %v990_v26 = vld [vmem:[#allocation4 + $0xa8] sm:$0xf0]  ;;  %v916_v28 = vld [vmem:[#allocation4 + $0x10] sm:$0xf] }
  0x28   :  { %398 = vmatpush.bf16.msra.mxu3 %v1005_v63  ;;  %v993_v27 = vor.u32 %v1256_v25, %v990_v26  ;;  %v1239_v29 = vld [vmem:[#allocation4 + $0x14] sm:$0xf0]  ;;  %v980_v30 = vld [vmem:[#allocation4 + $0x90] sm:$0xf]  ;;  %v1238_v33 = vld [vmem:[#allocation4 + $0x14] sm:$0xf] }
  0x29   :  { %v917_v31 = vor.u32 %v1239_v29, %v916_v28  ;;  %v1255_v32 = vld [vmem:[#allocation4 + $0x94] sm:$0xf0]  ;;  %v918_v34 = vld [vmem:[#allocation4 + $0x18] sm:$0xf0]  ;;  %v1254_v37 = vld [vmem:[#allocation4 + $0x94] sm:$0xf] }
  0x2a   :  { %410 = vmatpush.bf16.msrb.mxu0 %v953_v54  ;;  %v981_v35 = vor.u32 %v1255_v32, %v980_v30  ;;  %v921_v36 = vor.u32 %v1238_v33, %v918_v34  ;;  %v982_v38 = vld [vmem:[#allocation4 + $0x98] sm:$0xf0]  ;;  %v908_v39 = vld [vmem:[#allocation4] sm:$0xf]  ;;  %v1237_v41 = vld [vmem:[#allocation4 + $0x4] sm:$0xf0] }
  0x2b   :  { %423 = vmatpush.bf16.msrb.mxu1 %v1017_v55  ;;  %386 = vmatpush.bf16.msra.mxu2 %v933_v7  ;;  %v985_v40 = vor.u32 %v1254_v37, %v982_v38  ;;  %v972_v42 = vld [vmem:[#allocation4 + $0x80] sm:$0xf]  ;;  %v1253_v43 = vld [vmem:[#allocation4 + $0x84] sm:$0xf0]  ;;  %v909_v44 = vor.u32 %v1237_v41, %v908_v39  ;;  %v1236_v45 = vld [vmem:[#allocation4 + $0x4] sm:$0xf] }
  0x2c   :  { %399 = vmatpush.bf16.msra.mxu3 %v997_v11  ;;  %v910_v46 = vld [vmem:[#allocation4 + $0x8] sm:$0xf0]  ;;  %v1252_v47 = vld [vmem:[#allocation4 + $0x84] sm:$0xf]  ;;  %v973_v48 = vor.u32 %v1253_v43, %v972_v42  ;;  %v1158_v52 = vld [vmem:[#allocation6 + $0xf0] sm:$0xf] }
  0x2d   :  { %v913_v49 = vor.u32 %v1236_v45, %v910_v46  ;;  %v974_v50 = vld [vmem:[#allocation4 + $0x88] sm:$0xf0]  ;;  %v1299_v53 = vld [vmem:[#allocation6 + $0xf4] sm:$0xf0]  ;;  %v1298_v54 = vld [vmem:[#allocation6 + $0xf4] sm:$0xf] }
  0x2e   :  { %411 = vmatpush.bf16.msrb.mxu0 %v945_v0  ;;  %v977_v51 = vor.u32 %v1252_v47, %v974_v50  ;;  %v1159_v55 = vor.u32 %v1299_v53, %v1158_v52  ;;  %v1160_v56 = vld [vmem:[#allocation6 + $0xf8] sm:$0xf0]  ;;  %v1150_v57 = vld [vmem:[#allocation6 + $0xe0] sm:$0xf]  ;;  %v1297_v58 = vld [vmem:[#allocation6 + $0xe4] sm:$0xf0] }
  0x2f   :  { %424 = vmatpush.bf16.msrb.mxu1 %v1009_v3  ;;  %387 = vmatpush.bf16.msra.mxu2 %v925_v19  ;;  %v1163_v59 = vor.u32 %v1298_v54, %v1160_v56  ;;  %v1296_v60 = vld [vmem:[#allocation6 + $0xe4] sm:$0xf]  ;;  %v1152_v61 = vld [vmem:[#allocation6 + $0xe8] sm:$0xf0]  ;;  %v1094_v62 = vld [vmem:[#allocation6 + $0x70] sm:$0xf]  ;;  %v1151_v63 = vor.u32 %v1297_v58, %v1150_v57 }
  0x30   :  { %400 = vmatpush.bf16.msra.mxu3 %v989_v23  ;;  %v1283_v0 = vld [vmem:[#allocation6 + $0x74] sm:$0xf0]  ;;  %v1282_v1 = vld [vmem:[#allocation6 + $0x74] sm:$0xf]  ;;  %v1096_v2 = vld [vmem:[#allocation6 + $0x78] sm:$0xf0]  ;;  %v1155_v3 = vor.u32 %v1296_v60, %v1152_v61 }
  0x31   :  { %v1095_v4 = vor.u32 %v1283_v0, %v1094_v62  ;;  %v1099_v5 = vor.u32 %v1282_v1, %v1096_v2  ;;  %v1142_v6 = vld [vmem:[#allocation6 + $0xd0] sm:$0xf]  ;;  %v1295_v7 = vld [vmem:[#allocation6 + $0xd4] sm:$0xf0]  ;;  %v1294_v8 = vld [vmem:[#allocation6 + $0xd4] sm:$0xf] }
  0x32   :  { %412 = vmatpush.bf16.msrb.mxu0 %v937_v12  ;;  %v1144_v9 = vld [vmem:[#allocation6 + $0xd8] sm:$0xf0]  ;;  %v104_v10 = vld [vmem:[%s1529_s2] sm:$0x3]  ;;  %v1143_v11 = vor.u32 %v1295_v7, %v1142_v6  ;;  %v1086_v33 = vld [vmem:[#allocation6 + $0x60] sm:$0xf] }
  0x33   :  { %425 = vmatpush.bf16.msrb.mxu1 %v1001_v15  ;;  %388 = vmatpush.bf16.msra.mxu2 %v917_v31  ;;  %v1147_v12 = vor.u32 %v1294_v8, %v1144_v9  ;;  %v106_v13 = vperm.slane %v104_v10, 0  ;;  %v107_v14 = vperm.slane %v104_v10, 1  ;;  %v1281_v34 = vld [vmem:[#allocation6 + $0x64] sm:$0xf0]  ;;  %v1088_v37 = vld [vmem:[#allocation6 + $0x68] sm:$0xf0] }
  0x34   :  { %401 = vmatpush.bf16.msra.mxu3 %v981_v35  ;;  %v1280_v35 = vld [vmem:[#allocation6 + $0x64] sm:$0xf]  ;;  %v1134_v39 = vld [vmem:[#allocation6 + $0xc0] sm:$0xf]  ;;  %v1136_v43 = vld [vmem:[#allocation6 + $0xc8] sm:$0xf0] }
  0x35   :  { %v1091_v38 = vor.u32 %v1280_v35, %v1088_v37  ;;  %v1292_v41 = vld [vmem:[#allocation6 + $0xc4] sm:$0xf]  ;;  %v1078_v45 = vld [vmem:[#allocation6 + $0x50] sm:$0xf]  ;;  %v1279_v46 = vld [vmem:[#allocation6 + $0x54] sm:$0xf0] }
  0x36   :  { %413 = vmatpush.bf16.msrb.mxu0 %v929_v24  ;;  %v1278_v47 = vld [vmem:[#allocation6 + $0x54] sm:$0xf]  ;;  %v1291_v52 = vld [vmem:[#allocation6 + $0xb4] sm:$0xf0]  ;;  %v1070_v57 = vld [vmem:[#allocation6 + $0x40] sm:$0xf] }
  0x37   :  { %426 = vmatpush.bf16.msrb.mxu1 %v993_v27  ;;  %389 = vmatpush.bf16.msra.mxu2 %v909_v44  ;;  %v1139_v44 = vor.u32 %v1292_v41, %v1136_v43  ;;  %v1290_v53 = vld [vmem:[#allocation6 + $0xb4] sm:$0xf]  ;;  %v1277_v58 = vld [vmem:[#allocation6 + $0x44] sm:$0xf0]  ;;  %v1276_v60 = vld [vmem:[#allocation6 + $0x44] sm:$0xf] }
  0x38   :  { %402 = vmatpush.bf16.msra.mxu3 %v973_v48  ;;  %v1079_v48 = vor.u32 %v1279_v46, %v1078_v45  ;;  %v1072_v61 = vld [vmem:[#allocation6 + $0x48] sm:$0xf0]  ;;  %v1289_v0 = vld [vmem:[#allocation6 + $0xa4] sm:$0xf0]  ;;  %v1288_v1 = vld [vmem:[#allocation6 + $0xa4] sm:$0xf] }
  0x39   :  { %v1075_v62 = vor.u32 %v1276_v60, %v1072_v61  ;;  %v1275_v6 = vld [vmem:[#allocation6 + $0x34] sm:$0xf0]  ;;  %v1274_v7 = vld [vmem:[#allocation6 + $0x34] sm:$0xf]  ;;  %v1064_v9 = vld [vmem:[#allocation6 + $0x38] sm:$0xf0] }
  0x3a   :  { %414 = vmatpush.bf16.msrb.mxu0 %v921_v36  ;;  %v1087_v36 = vor.u32 %v1281_v34, %v1086_v33  ;;  %v1067_v10 = vor.u32 %v1274_v7, %v1064_v9  ;;  %v1048_v33 = vld [vmem:[#allocation6 + $0x18] sm:$0xf0]  ;;  %v1038_v35 = vld [vmem:[#allocation6] sm:$0xf]  ;;  %v1268_v37 = vld [vmem:[#allocation6 + $0x4] sm:$0xf] }
  0x3b   :  { %427 = vmatpush.bf16.msrb.mxu1 %v985_v40  ;;  %646 = vmatpush.bf16.msrb.mxu2 %v1095_v4  ;;  %v1293_v40 = vld [vmem:[#allocation6 + $0xc4] sm:$0xf0]  ;;  %v216_v41 = vld [vmem:[%s1531_s4] sm:$0x3]  ;;  %v1312_v9 = vld [vmem:[#allocation7 + $0x60] sm:$0xff] }
  0x3c   :  { %659 = vmatpush.bf16.msrb.mxu3 %v1159_v55  ;;  %v1135_v42 = vor.u32 %v1293_v40, %v1134_v39  ;;  %v1128_v55 = vld [vmem:[#allocation6 + $0xb8] sm:$0xf0]  ;;  %v1040_v39 = vld [vmem:[#allocation6 + $0x8] sm:$0xf0]  ;;  %v219_v43 = vperm.slane %v216_v41, 1 }
  0x3d   :  { %v1131_v56 = vor.u32 %v1290_v53, %v1128_v55  ;;  %v1043_v40 = vor.u32 %v1268_v37, %v1040_v39  ;;  %v1313_v7 = vld [vmem:[#allocation7 + $0x68] sm:$0xff] }
  0x3e   :  { %415 = vmatpush.bf16.msrb.mxu0 %v913_v49  ;;  %v1080_v49 = vld [vmem:[#allocation6 + $0x58] sm:$0xf0] }
  0x3f   :  { %428 = vmatpush.bf16.msrb.mxu1 %v977_v51  ;;  %647 = vmatpush.bf16.msrb.mxu2 %v1087_v36  ;;  %v1083_v50 = vor.u32 %v1278_v47, %v1080_v49  ;;  %v1126_v51 = vld [vmem:[#allocation6 + $0xb0] sm:$0xf]  ;;  %v1269_v36 = vld [vmem:[#allocation6 + $0x4] sm:$0xf0] }
  0x40   :  { %660 = vmatpush.bf16.msrb.mxu3 %v1151_v63  ;;  %v1127_v54 = vor.u32 %v1291_v52, %v1126_v51  ;;  %v1118_v63 = vld [vmem:[#allocation6 + $0xa0] sm:$0xf] }
  0x41   :  { %v1119_v2 = vor.u32 %v1289_v0, %v1118_v63 }
  0x42   :  { %672 = vmatpush.bf16.msra.mxu0 %v1099_v5  ;;  %v1062_v5 = vld [vmem:[#allocation6 + $0x30] sm:$0xf] }
  0x43   :  { %685 = vmatpush.bf16.msra.mxu1 %v1163_v59  ;;  %648 = vmatpush.bf16.msrb.mxu2 %v1079_v48  ;;  %v1071_v59 = vor.u32 %v1277_v58, %v1070_v57  ;;  %v1063_v8 = vor.u32 %v1275_v6, %v1062_v5  ;;  %v218_v48 = vperm.slane %v216_v41, 0  ;;  %v1314_v5 = vld [vmem:[#allocation7 + $0x70] sm:$0xff]  ;;  %v1307_v6 = vld [vmem:[#allocation7 + $0x38] sm:$0xff] }
  0x44   :  { %661 = vmatpush.bf16.msrb.mxu3 %v1143_v11  ;;  %v1110_v11 = vld [vmem:[#allocation6 + $0x90] sm:$0xf] }
  0x46   :  { %673 = vmatpush.bf16.msra.mxu0 %v1091_v38  ;;  %v1039_v38 = vor.u32 %v1269_v36, %v1038_v35 }
  0x47   :  { %686 = vmatpush.bf16.msra.mxu1 %v1155_v3  ;;  %649 = vmatpush.bf16.msrb.mxu2 %v1071_v59  ;;  %v1120_v3 = vld [vmem:[#allocation6 + $0xa8] sm:$0xf0] }
  0x48   :  { %662 = vmatpush.bf16.msrb.mxu3 %v1135_v42  ;;  %v1123_v4 = vor.u32 %v1288_v1, %v1120_v3  ;;  %v1315_v42 = vld [vmem:[#allocation7 + $0x78] sm:$0xff] }
  0x4a   :  { %674 = vmatpush.bf16.msra.mxu0 %v1083_v50 }
  0x4b   :  { %687 = vmatpush.bf16.msra.mxu1 %v1147_v12  ;;  %v1287_v12 = vld [vmem:[#allocation6 + $0x94] sm:$0xf0]  ;;  %650 = vmatpush.bf16.msrb.mxu2 %v1063_v8  ;;  %v1306_v8 = vld [vmem:[#allocation7 + $0x30] sm:$0xff] }
  0x4c   :  { %663 = vmatpush.bf16.msrb.mxu3 %v1127_v54 }
  0x4e   :  { %675 = vmatpush.bf16.msra.mxu0 %v1075_v62 }
  0x4f   :  { %688 = vmatpush.bf16.msra.mxu1 %v1139_v44 }
  0x50   :  { %664 = vmatpush.bf16.msrb.mxu3 %v1119_v2 }
  0x52   :  { %676 = vmatpush.bf16.msra.mxu0 %v1067_v10  ;;  %v1305_v10 = vld [vmem:[#allocation7 + $0x28] sm:$0xff] }
  0x53   :  { %689 = vmatpush.bf16.msra.mxu1 %v1131_v56 }
  0x57   :  { %690 = vmatpush.bf16.msra.mxu1 %v1123_v4 }
  0x9e   :  { %v153_v15 = vpop.f32.mrf.mxu0 }
  0x9f   :  { %v154_v16 = vadd.f32 %v153_v15, %v106_v13  ;;  %v166_v17 = vpop.f32.mrf.mxu1  ;;  %v1286_v13 = vld [vmem:[#allocation6 + $0x94] sm:$0xf]  ;;  %v1112_v15 = vld [vmem:[#allocation6 + $0x98] sm:$0xf0] }
  0xa0   :  { %v167_v18 = vadd.f32 %v166_v17, %v107_v14  ;;  %v1111_v14 = vor.u32 %v1287_v12, %v1110_v11  ;;  %v1054_v17 = vld [vmem:[#allocation6 + $0x20] sm:$0xf]  ;;  %v1311_v11 = vld [vmem:[#allocation7 + $0x58] sm:$0xff] }
  0xa1   :  { %v172_v19 = vmin.f32 %v154_v16, 0.0  ;;  %vm170_vm1 = vcmp.gt.f32.partialorder %v154_v16, 0.0  ;;  %v1304_v12 = vld [vmem:[#allocation7 + $0x20] sm:$0xff] }
  0xa2   :  { %v173_v20 = vmin.f32 %v167_v18, 0.0  ;;  %vm171_vm2 = vcmp.gt.f32.partialorder %v167_v18, 0.0  ;;  %665 = vmatpush.bf16.msrb.mxu3 %v1111_v14  ;;  %v1303_v14 = vld [vmem:[#allocation7 + $0x18] sm:$0xff] }
  0xa3   :  { %v174_v21 = vmul.f32 1.442695, %v172_v19  ;;  %v1272_v19 = vld [vmem:[#allocation6 + $0x24] sm:$0xf] }
  0xa4   :  { %v176_v22 = vmul.f32 1.442695, %v173_v20 }
  0xa5   :  { %1325 = vpow2.f32 %v174_v21  ;;  %v1056_v21 = vld [vmem:[#allocation6 + $0x28] sm:$0xf0] }
  0xa6   :  { %1327 = vpow2.f32 %v176_v22  ;;  %v155_v23 = vpop.f32.mrf.mxu0  ;;  %v1059_v22 = vor.u32 %v1272_v19, %v1056_v21  ;;  %v1300_v19 = vld [vmem:[#allocation7] sm:$0xff]  ;;  %v480_v21 = vld [vmem:[%s1533_s6] sm:$0x3] }
  0xa7   :  { %v168_v24 = vpop.f32.mrf.mxu1  ;;  %v1102_v23 = vld [vmem:[#allocation6 + $0x80] sm:$0xf] }
  0xa8   :  { %v1285_v24 = vld [vmem:[#allocation6 + $0x84] sm:$0xf0]  ;;  %677 = vmatpush.bf16.msra.mxu0 %v1059_v22  ;;  %v483_v22 = vperm.slane %v480_v21, 1 }
  0xab   :  { %v1326_v25 = vpop.eup %1325 }
  0xac   :  { %v1328_v26 = vpop.eup %1327  ;;  %v904_v27 = vadd.f32 -1.0, %v1326_v25  ;;  %v1284_v25 = vld [vmem:[#allocation6 + $0x84] sm:$0xf] }
  0xad   :  { %v905_v28 = vadd.f32 -1.0, %v1328_v26  ;;  %v1103_v26 = vor.u32 %v1285_v24, %v1102_v23 }
  0xae   :  { %v180_v29 = vsel %vm170_vm1, %v154_v16, %v904_v27  ;;  %v1115_v16 = vor.u32 %v1286_v13, %v1112_v15  ;;  %v1104_v27 = vld [vmem:[#allocation6 + $0x88] sm:$0xf0]  ;;  %v1310_v13 = vld [vmem:[#allocation7 + $0x50] sm:$0xff] }
  0xaf   :  { %v182_v30 = vpack.c.bf16 %v180_v29, %v180_v29  ;;  %v181_v31 = vsel %vm171_vm2, %v167_v18, %v905_v28  ;;  %v1273_v18 = vld [vmem:[#allocation6 + $0x24] sm:$0xf0]  ;;  %v1107_v28 = vor.u32 %v1284_v25, %v1104_v27  ;;  %v1046_v29 = vld [vmem:[#allocation6 + $0x10] sm:$0xf]  ;;  %666 = vmatpush.bf16.msrb.mxu3 %v1103_v26 }
  0xb0   :  { %v183_v32 = vpack.c.bf16 %v181_v31, %v181_v31  ;;  %v1055_v20 = vor.u32 %v1273_v18, %v1054_v17  ;;  %691 = vmatpush.bf16.msra.mxu1 %v1115_v16  ;;  %v1270_v31 = vld [vmem:[#allocation6 + $0x14] sm:$0xf]  ;;  %v1309_v15 = vld [vmem:[#allocation7 + $0x48] sm:$0xff]  ;;  %v1308_v17 = vld [vmem:[#allocation7 + $0x40] sm:$0xff] }
  0xb1   :  { %390 = vmatmul.bf16.vlgmr.msra.gmra.mxu2 %v182_v30  ;;  %416 = vmatmul.bf16.vlgmr.msrb.gmra.mxu0 %v182_v30  ;;  %v1271_v30 = vld [vmem:[#allocation6 + $0x14] sm:$0xf0]  ;;  %v1051_v34 = vor.u32 %v1270_v31, %v1048_v33  ;;  %v1302_v16 = vld [vmem:[#allocation7 + $0x10] sm:$0xff]  ;;  %v1301_v18 = vld [vmem:[#allocation7 + $0x8] sm:$0xff] }
  0xb2   :  { %403 = vmatmul.bf16.vlgmr.msra.gmra.mxu3 %v183_v32  ;;  %429 = vmatmul.bf16.vlgmr.msrb.gmra.mxu1 %v183_v32  ;;  %v1047_v32 = vor.u32 %v1271_v30, %v1046_v29 }
  0xb3   :  { %651 = vmatpush.bf16.msrb.mxu2 %v1055_v20  ;;  %678 = vmatpush.bf16.msra.mxu0 %v1051_v34 }
  0xb4   :  { %692 = vmatpush.bf16.msra.mxu1 %v1107_v28  ;;  %857 = vmatpush.bf16.msra.mxu3 %v1315_v42  ;;  %v482_v28 = vperm.slane %v480_v21, 0 }
  0xb7   :  { %652 = vmatpush.bf16.msrb.mxu2 %v1047_v32  ;;  %679 = vmatpush.bf16.msra.mxu0 %v1043_v40 }
  0xb8   :  { %858 = vmatpush.bf16.msra.mxu3 %v1314_v5 }
  0xbb   :  { %653 = vmatpush.bf16.msrb.mxu2 %v1039_v38 }
  0xbc   :  { %859 = vmatpush.bf16.msra.mxu3 %v1313_v7 }
  0xbf   :  { %844 = vmatpush.bf16.msra.mxu2 %v1307_v6 }
  0xc0   :  { %860 = vmatpush.bf16.msra.mxu3 %v1312_v9 }
  0xc3   :  { %845 = vmatpush.bf16.msra.mxu2 %v1306_v8 }
  0xc4   :  { %861 = vmatpush.bf16.msra.mxu3 %v1311_v11 }
  0xc7   :  { %846 = vmatpush.bf16.msra.mxu2 %v1305_v10 }
  0xc8   :  { %862 = vmatpush.bf16.msra.mxu3 %v1310_v13 }
  0xcb   :  { %847 = vmatpush.bf16.msra.mxu2 %v1304_v12 }
  0xcc   :  { %863 = vmatpush.bf16.msra.mxu3 %v1309_v15 }
  0xcf   :  { %848 = vmatpush.bf16.msra.mxu2 %v1303_v14 }
  0xd0   :  { %864 = vmatpush.bf16.msra.mxu3 %v1308_v17 }
  0xd3   :  { %849 = vmatpush.bf16.msra.mxu2 %v1302_v16 }
  0xd7   :  { %850 = vmatpush.bf16.msra.mxu2 %v1301_v18 }
  0xdb   :  { %851 = vmatpush.bf16.msra.mxu2 %v1300_v19 }
 0x12e   :  { %v417_v44 = vpop.f32.mrf.mxu0 }
 0x12f   :  { %v418_v45 = vadd.f32 %v417_v44, %v219_v43  ;;  %v430_v46 = vpop.f32.mrf.mxu1 }
 0x131   :  { %v431_v47 = vadd.f32 %v430_v46, %v418_v45 }
 0x133   :  { %v437_v49 = vmin.f32 %v431_v47, 0.0  ;;  %vm435_vm3 = vcmp.gt.f32.partialorder %v431_v47, 0.0 }
 0x134   :  { %v391_v50 = vpop.f32.mrf.mxu2 }
 0x135   :  { %v440_v51 = vmul.f32 1.442695, %v437_v49  ;;  %v392_v52 = vadd.f32 %v391_v50, %v218_v48  ;;  %v404_v53 = vpop.f32.mrf.mxu3  ;;  %v1324_v48 = vld [vmem:[%s1535_s8] ss:$0 sm:$0xff] }
 0x136   :  { %v419_v54 = vpop.f32.mrf.mxu0 }
 0x137   :  { %1329 = vpow2.f32 %v440_v51  ;;  %v405_v55 = vadd.f32 %v404_v53, %v392_v52  ;;  %v432_v56 = vpop.f32.mrf.mxu1 }
 0x139   :  { %v436_v57 = vmin.f32 %v405_v55, 0.0  ;;  %vm434_vm4 = vcmp.gt.f32.partialorder %v405_v55, 0.0 }
 0x13b   :  { %v438_v58 = vmul.f32 1.442695, %v436_v57 }
 0x13c   :  { %v393_v59 = vpop.f32.mrf.mxu2 }
 0x13d   :  { %v1330_v60 = vpop.eup %1329  ;;  %1331 = vpow2.f32 %v438_v58  ;;  %v406_v61 = vpop.f32.mrf.mxu3 }
 0x13e   :  { %v1035_v62 = vadd.f32 -1.0, %v1330_v60 }
 0x140   :  { %v445_v63 = vsel %vm435_vm3, %v431_v47, %v1035_v62 }
 0x141   :  { %v447_v0 = vpack.c.bf16 %v445_v63, %v445_v63 }
 0x143   :  { %v1332_v1 = vpop.eup %1331  ;;  %667 = vmatmul.bf16.vlgmr.msrb.gmra.mxu3 %v447_v0  ;;  %693 = vmatmul.bf16.vlgmr.msra.gmra.mxu1 %v447_v0 }
 0x144   :  { %v1034_v2 = vadd.f32 -1.0, %v1332_v1 }
 0x146   :  { %v444_v3 = vsel %vm434_vm4, %v405_v55, %v1034_v2 }
 0x147   :  { %v446_v4 = vpack.c.bf16 %v444_v3, %v444_v3 }
 0x149   :  { %654 = vmatmul.bf16.vlgmr.msrb.gmra.mxu2 %v446_v4  ;;  %680 = vmatmul.bf16.vlgmr.msra.gmra.mxu0 %v446_v4 }
 0x1c0   :  { %v694_v20 = vpop.f32.mrf.mxu1 }
 0x1c6   :  { %v668_v23 = vpop.f32.mrf.mxu3  ;;  %v681_v24 = vpop.f32.mrf.mxu0 }
 0x1c7   :  { %v682_v25 = vadd.f32 %v681_v24, %v483_v22 }
 0x1c8   :  { %v696_v26 = vpop.f32.mrf.mxu1 }
 0x1c9   :  { %v695_v27 = vadd.f32 %v694_v20, %v682_v25 }
 0x1cb   :  { %v701_v29 = vmin.f32 %v695_v27, 0.0  ;;  %vm699_vm5 = vcmp.gt.f32.partialorder %v695_v27, 0.0 }
 0x1cc   :  { %v655_v30 = vpop.f32.mrf.mxu2 }
 0x1cd   :  { %v704_v31 = vmul.f32 1.442695, %v701_v29  ;;  %v656_v32 = vadd.f32 %v655_v30, %v482_v28 }
 0x1ce   :  { %v670_v33 = vpop.f32.mrf.mxu3  ;;  %v683_v34 = vpop.f32.mrf.mxu0 }
 0x1cf   :  { %1333 = vpow2.f32 %v704_v31  ;;  %v669_v35 = vadd.f32 %v668_v23, %v656_v32 }
 0x1d1   :  { %v700_v36 = vmin.f32 %v669_v35, 0.0  ;;  %vm698_vm6 = vcmp.gt.f32.partialorder %v669_v35, 0.0 }
 0x1d3   :  { %v702_v37 = vmul.f32 1.442695, %v700_v36 }
 0x1d4   :  { %v657_v38 = vpop.f32.mrf.mxu2 }
 0x1d5   :  { %v1334_v39 = vpop.eup %1333  ;;  %1335 = vpow2.f32 %v702_v37 }
 0x1d6   :  { %v1165_v40 = vadd.f32 -1.0, %v1334_v39 }
 0x1d8   :  { %v709_v41 = vsel %vm699_vm5, %v695_v27, %v1165_v40 }
 0x1d9   :  { %v711_v42 = vpack.c.bf16 %v709_v41, %v709_v41 }
 0x1db   :  { %v1336_v43 = vpop.eup %1335  ;;  %865 = vmatmul.bf16.vlgmr.msra.gmra.mxu3 %v711_v42 }
 0x1dc   :  { %v1164_v44 = vadd.f32 -1.0, %v1336_v43 }
 0x1de   :  { %v708_v45 = vsel %vm698_vm6, %v669_v35, %v1164_v44 }
 0x1df   :  { %v710_v46 = vpack.c.bf16 %v708_v45, %v708_v45 }
 0x1e1   :  { %852 = vmatmul.bf16.vlgmr.msra.gmra.mxu2 %v710_v46 }
 0x25e   :  { %v866_v47 = vpop.f32.mrf.mxu3 }
 0x264   :  { %v853_v49 = vpop.f32.mrf.mxu2 }
 0x265   :  { %v854_v50 = vadd.f32 %v1324_v48, %v853_v49 }
 0x266   :  { %v868_v51 = vpop.f32.mrf.mxu3 }
 0x267   :  { %v867_v52 = vadd.f32 %v866_v47, %v854_v50 }
 0x269   :  { %870 = vst [vmem:[%s1536_s9] sm:$0xff] %v867_v52 }
 0x26c   :  { %v855_v53 = vpop.f32.mrf.mxu2 }
 0x26d   :  { %875 = vsyncpa [#allocation3], 1 }
 0x26e   :  { %876 = vsyncpa [#allocation5], 1 }
 0x26f   :  { %877 = vsyncpa [#allocation8], 1 }

</bundles_post_ra>
